<compile_context>
chip_gen: v6e
topology: v6e:2x2x1
jax: 0.10.0
libtpu: 0.0.40
codegen_flags: <defaults>
</compile_context>

<pallas_src>
import functools

import jax
import jax.numpy as jnp
from jax.experimental import pallas as pl
from jax.experimental.pallas import tpu as pltpu


def _round_up(n, m):
    return ((n + m - 1) // m) * m


def _cln_kernel(x_ref, mem_ref, w1_ref, b1_ref, w2g_ref, w2b_ref,
                b2g_ref, b2b_ref, o_ref, *, eps, d_model, mm_dtype, approx_recip):
    x = x_ref[...].astype(jnp.float32)                      # (TM, D)      f32
    # Cast memory to the MXU dtype *inside* the kernel: the VPU cast is hidden under
    # the MXU work, and HBM traffic stays at the original dtype (no wrapper astype).
    mem = mem_ref[...].astype(mm_dtype)                     # (TM, RM_IN)

    # Fused first layers of mlp_gamma / mlp_beta: one (TM,RM_IN)x(RM_IN,2D) MXU matmul.
    h = jnp.dot(mem, w1_ref[...], preferred_element_type=jnp.float32) + b1_ref[...]
    h = jnp.maximum(h, 0.0)                                 # ReLU (f32)
    # NOTE: these slices are lane-aligned (free) only when d_model % 128 == 0
    # (production configs); the toy D=32 config falls back to cross-lane copies.
    h_g = h[:, :d_model].astype(w2g_ref.dtype)
    h_b = h[:, d_model:].astype(w2b_ref.dtype)

    # Second layers. gamma/beta are already folded into b2g/b2b by the wrapper:
    #   gamma + (h@W2 + b2) == h@W2 + (b2 + gamma)
    gamma_hat = jnp.dot(h_g, w2g_ref[...], preferred_element_type=jnp.float32) + b2g_ref[...]
    beta_hat = jnp.dot(h_b, w2b_ref[...], preferred_element_type=jnp.float32) + b2b_ref[...]

    # Per-row mean / UNBIASED std (torch.Tensor.std default, ddof=1); eps added to std.
    # Two-pass form kept deliberately: the one-pass sum/sum-of-squares rewrite can
    # cancel catastrophically and the XLU reductions are not the critical slot here.
    mean = jnp.mean(x, axis=-1, keepdims=True)
    diff = x - mean
    var_unbiased = jnp.sum(diff * diff, axis=-1, keepdims=True) / jnp.float32(d_model - 1)
    std = jnp.sqrt(var_unbiased)
    if approx_recip:
        inv = pl.reciprocal(std + eps, approx=True)         # (TM, 1) on the EUP
    else:
        inv = 1.0 / (std + eps)

    o_ref[...] = (gamma_hat * (diff * inv) + beta_hat).astype(o_ref.dtype)


def conditional_layer_norm(x, memory, params, *, eps=1e-6, tm=512, use_bf16=True):
    """x: (B, S, D), memory: (B, S, RM_IN). Returns (B, S, D) in x.dtype."""
    B, S, D = x.shape
    RM_IN = memory.shape[-1]
    (w1g, b1g, w2g, b2g, w1b, b1b, w2b, b2b, gamma, beta) = params

    # The original module only type-checks when rm_d_model == d_model; fail loudly.
    assert w2g.shape == (D, D), (
        f"ConditionalLayerNorm requires rm_d_model == d_model; got mlp_gamma second "
        f"Linear weight {w2g.shape} with d_model={D}")
    assert w2b.shape == (D, D)
    assert w1g.shape == (RM_IN, D) and w1b.shape == (RM_IN, D)

    N = B * S
    x2 = x.reshape(N, D)
    mem2 = memory.reshape(N, RM_IN)

    # Row tile: as large as possible (amortizes MXU weight fill + ~0.35 us/step grid
    # overhead), clamped to a multiple of 16 (bf16 sublane packing) and so the grid
    # keeps >= 2 steps when N allows (v7x has 2 TensorCores).  No jnp.pad: a pl.cdiv
    # grid lets Pallas mask the ragged last block's stores, so there is no extra HBM
    # round trip for padding.  Sweep tm in {256, 512, 1024} per generation; on v5e
    # (HBM-bound) prefer the smaller end.
    tm_eff = max(16, min(tm, _round_up(pl.cdiv(N, 2), 16)))
    grid = (pl.cdiv(N, tm_eff),)

    # One-time param packing (tiny arrays; wrapper-side cost negligible):
    #  * fuse the two first-layer Linears into a single (RM_IN, 2D) weight,
    #  * fold gamma/beta into the second-layer biases.
    w1 = jnp.concatenate([w1g, w1b], axis=1)                       # (RM_IN, 2D)
    b1 = jnp.concatenate([b1g, b1b], axis=1).astype(jnp.float32)   # (1, 2D)
    b2g_eff = (b2g + gamma).astype(jnp.float32)                    # (1, D)
    b2b_eff = (b2b + beta).astype(jnp.float32)                     # (1, D)

    # bf16 MXU operands with f32 accumulation; x / stats / elementwise stay f32
    # (v5e has no bf16 VPU/EUP).  use_bf16=False gives an exact f32 path.
    # TODO(synk): optional fp8 (v7x) / int8 (v6e) first-layer matmul when RM_IN >> D.
    mm_dtype = jnp.bfloat16 if use_bf16 else jnp.float32
    w1 = w1.astype(mm_dtype)
    w2g_c = w2g.astype(mm_dtype)
    w2b_c = w2b.astype(mm_dtype)

    row_spec = lambda shape: pl.BlockSpec(shape, lambda i: (i, 0))
    # Grid-invariant operands: single-buffered — no point double-buffering constants.
    # If profiling shows exposed DMA on the row tiles (small RM_IN), bump the row
    # specs to pipeline_mode=pl.Buffered(3) and re-check the VMEM budget.
    const_spec = lambda shape: pl.BlockSpec(shape, lambda i: (0, 0),
                                            pipeline_mode=pl.Buffered(1))

    # VMEM budget: pipelined row tiles (double-buffered), resident weights, and the
    # kernel-local intermediates (h, h_g/h_b, gamma_hat/beta_hat, diff, f32 x copy,
    # bf16 mem copy).  Cap derived from the actual chip's physical VMEM.
    def _nbytes(a):
        return a.size * a.dtype.itemsize
    mm_bytes = jnp.dtype(mm_dtype).itemsize
    tile_bytes = 2 * tm_eff * (D * x.dtype.itemsize            # x tile
                               + RM_IN * memory.dtype.itemsize  # mem tile
                               + D * x.dtype.itemsize)          # out tile
    weight_bytes = sum(_nbytes(a) for a in (w1, b1, w2g_c, w2b_c, b2g_eff, b2b_eff))
    interm_bytes = tm_eff * (D * 4                # x in f32
                             + RM_IN * mm_bytes   # mem cast
                             + 2 * D * 4          # h (tm, 2D) f32
                             + 2 * D * mm_bytes   # h_g + h_b
                             + 2 * D * 4          # gamma_hat + beta_hat
                             + D * 4)             # diff
    vmem_need = int(1.25 * (tile_bytes + weight_bytes + interm_bytes)) + (4 << 20)

    phys_vmem = 64 << 20
    try:
        info = pltpu.get_tpu_info()
        phys_vmem = int(getattr(info, "vmem_capacity_bytes", phys_vmem))
    except Exception:
        pass
    vmem_cap = (phys_vmem * 3) // 4      # ~48 MiB on v7x, ~96 MiB on v5e/v6e
    vmem_limit = min(max(vmem_need, 32 << 20), vmem_cap)

    # Note: for production, D and RM_IN should be multiples of 128 so the h-slices
    # are lane-aligned and the (tm, D) output stores are unmasked (lane-dense) vst.
    out = pl.pallas_call(
        functools.partial(_cln_kernel, eps=eps, d_model=D, mm_dtype=mm_dtype,
                          approx_recip=use_bf16),
        out_shape=jax.ShapeDtypeStruct((N, D), x.dtype),
        grid_spec=pltpu.PrefetchScalarGridSpec(
            num_scalar_prefetch=0,
            grid=grid,
            in_specs=[
                row_spec((tm_eff, D)),          # x
                row_spec((tm_eff, RM_IN)),      # memory
                const_spec((RM_IN, 2 * D)),     # W1 = [w1g | w1b]
                const_spec((1, 2 * D)),         # b1 = [b1g | b1b]
                const_spec((D, D)),             # w2g
                const_spec((D, D)),             # w2b
                const_spec((1, D)),             # b2g + gamma
                const_spec((1, D)),             # b2b + beta
            ],
            out_specs=row_spec((tm_eff, D)),
        ),
        compiler_params=pltpu.CompilerParams(
            dimension_semantics=("parallel",),
            vmem_limit_bytes=vmem_limit),
    )(x2, mem2, w1, b1, w2g_c, w2b_c, b2g_eff, b2b_eff)

    return out.reshape(B, S, D)


def _xavier_uniform(key, fan_in, fan_out):
    # PyTorch nn.init.xavier_uniform_ on Linear weight (out, in); we store (in, out).
    bound = (6.0 / (fan_in + fan_out)) ** 0.5
    return jax.random.uniform(key, (fan_in, fan_out), jnp.float32, -bound, bound)


def make_params(key, d_model, rm_num_slots, rm_d_model):
    rm_in = rm_num_slots * rm_d_model
    k1, k2, k3, k4 = jax.random.split(key, 4)
    # mlp_gamma: Linear(rm_in, d_model) -> ReLU -> Linear(rm_d_model, rm_d_model)
    w1g = _xavier_uniform(k1, rm_in, d_model)
    b1g = jnp.full((1, d_model), 0.1, jnp.float32)
    w2g = _xavier_uniform(k2, rm_d_model, rm_d_model)
    b2g = jnp.full((1, rm_d_model), 0.1, jnp.float32)
    # mlp_beta: Linear(rm_in, d_model) -> ReLU -> Linear(d_model, d_model)
    w1b = _xavier_uniform(k3, rm_in, d_model)
    b1b = jnp.full((1, d_model), 0.1, jnp.float32)
    w2b = _xavier_uniform(k4, d_model, d_model)
    b2b = jnp.full((1, d_model), 0.1, jnp.float32)
    gamma = jnp.ones((1, d_model), jnp.float32)
    beta = jnp.zeros((1, d_model), jnp.float32)
    return (w1g, b1g, w2g, b2g, w1b, b1b, w2b, b2b, gamma, beta)


def reference(x, memory, params, eps=1e-6):
    """Pure-f32 JAX reference matching the PyTorch module."""
    (w1g, b1g, w2g, b2g, w1b, b1b, w2b, b2b, gamma, beta) = params
    mean = jnp.mean(x, axis=-1, keepdims=True)
    std = jnp.std(x, axis=-1, keepdims=True, ddof=1)
    dg = jnp.maximum(memory @ w1g + b1g[0], 0.0) @ w2g + b2g[0]
    db = jnp.maximum(memory @ w1b + b1b[0], 0.0) @ w2b + b2b[0]
    gamma_hat = gamma[0] + dg
    beta_hat = beta[0] + db
    return gamma_hat * (x - mean) / (std + eps) + beta_hat


if __name__ == "__main__":
    B, S = 2, 8
    d_model = 32
    rm_num_slots = 4
    rm_d_model = 32            # must equal d_model for the original module to type-check
    rm_in = rm_num_slots * rm_d_model

    key = jax.random.PRNGKey(0)
    kx, km, kp = jax.random.split(key, 3)
    x = jax.random.normal(kx, (B, S, d_model), jnp.float32)
    memory = jax.random.normal(km, (B, S, rm_in), jnp.float32)
    params = make_params(kp, d_model, rm_num_slots, rm_d_model)

    out = conditional_layer_norm(x, memory, params)
    out = jax.block_until_ready(out)

    ref = reference(x, memory, params)
    assert out.shape == (B, S, d_model)
    # bf16 MXU matmuls + approx reciprocal vs. pure-f32 reference -> loose tolerance.
    assert jnp.allclose(out, ref, atol=3e-2, rtol=3e-2), "mismatch vs JAX reference"

    # Exact path (f32 matmuls, exact reciprocal) must match tightly.
    out_exact = jax.block_until_ready(
        conditional_layer_norm(x, memory, params, use_bf16=False))
    assert jnp.allclose(out_exact, ref, atol=1e-4, rtol=1e-4), "exact-path mismatch"

    print("KERNEL_OK")
</pallas_src>

<mosaic_0001>
module attributes {stable_mosaic.version = 11 : i64} {
  func.func @_cln_kernel(%arg0: i32, %arg1: memref<16x32xf32, #tpu.memory_space<vmem>>, %arg2: memref<16x128xf32, #tpu.memory_space<vmem>>, %arg3: memref<128x64xbf16, #tpu.memory_space<vmem>>, %arg4: memref<1x64xf32, #tpu.memory_space<vmem>>, %arg5: memref<32x32xbf16, #tpu.memory_space<vmem>>, %arg6: memref<32x32xbf16, #tpu.memory_space<vmem>>, %arg7: memref<1x32xf32, #tpu.memory_space<vmem>>, %arg8: memref<1x32xf32, #tpu.memory_space<vmem>>, %arg9: memref<16x32xf32, #tpu.memory_space<vmem>>) attributes {dimension_semantics = [#tpu.dimension_semantics<parallel>], iteration_bounds = array<i64: 1>, scalar_prefetch = 0 : i64, scratch_operands = 0 : i64, tpu.core_type = #tpu.core_type<tc>, window_params = [{transform_indices = @transform_0, window_bounds = array<i64: 16, 32>}, {transform_indices = @transform_1, window_bounds = array<i64: 16, 128>}, {pipeline_mode = #tpu.pipeline_mode<synchronous>, transform_indices = @transform_2, window_bounds = array<i64: 128, 64>}, {pipeline_mode = #tpu.pipeline_mode<synchronous>, transform_indices = @transform_3, window_bounds = array<i64: 1, 64>}, {pipeline_mode = #tpu.pipeline_mode<synchronous>, transform_indices = @transform_4, window_bounds = array<i64: 32, 32>}, {pipeline_mode = #tpu.pipeline_mode<synchronous>, transform_indices = @transform_5, window_bounds = array<i64: 32, 32>}, {pipeline_mode = #tpu.pipeline_mode<synchronous>, transform_indices = @transform_6, window_bounds = array<i64: 1, 32>}, {pipeline_mode = #tpu.pipeline_mode<synchronous>, transform_indices = @transform_7, window_bounds = array<i64: 1, 32>}, {transform_indices = @transform_8, window_bounds = array<i64: 16, 32>}]} {
    %c0 = arith.constant 0 : index
    %c0_0 = arith.constant 0 : index
    %0 = vector.load %arg1[%c0, %c0_0] : memref<16x32xf32, #tpu.memory_space<vmem>>, vector<16x32xf32>
    %c0_1 = arith.constant 0 : index
    %c0_2 = arith.constant 0 : index
    %1 = vector.load %arg2[%c0_1, %c0_2] : memref<16x128xf32, #tpu.memory_space<vmem>>, vector<16x128xf32>
    %2 = arith.truncf %1 : vector<16x128xf32> to vector<16x128xbf16>
    %c0_3 = arith.constant 0 : index
    %c0_4 = arith.constant 0 : index
    %3 = vector.load %arg3[%c0_3, %c0_4] : memref<128x64xbf16, #tpu.memory_space<vmem>>, vector<128x64xbf16>
    %cst = arith.constant dense<0.000000e+00> : vector<16x64xf32>
    %4 = tpu.matmul %2, %3, %cst {dimension_numbers = #tpu.dot_dimension_numbers<[1], [0], [0], [1], [0, 0, 1, 1], [], []>} : vector<16x128xbf16>, vector<128x64xbf16>, vector<16x64xf32> -> vector<16x64xf32>
    %c0_5 = arith.constant 0 : index
    %c0_6 = arith.constant 0 : index
    %5 = vector.load %arg4[%c0_5, %c0_6] : memref<1x64xf32, #tpu.memory_space<vmem>>, vector<1x64xf32>
    %6 = vector.broadcast %5 : vector<1x64xf32> to vector<16x64xf32>
    %7 = arith.addf %4, %6 : vector<16x64xf32>
    %cst_7 = arith.constant 0.000000e+00 : f32
    %8 = vector.broadcast %cst_7 : f32 to vector<16x64xf32>
    %9 = arith.maximumf %7, %8 : vector<16x64xf32>
    %10 = vector.extract_strided_slice %9 {offsets = [0, 0], sizes = [16, 32], strides = [1, 1]} : vector<16x64xf32> to vector<16x32xf32>
    %11 = arith.truncf %10 : vector<16x32xf32> to vector<16x32xbf16>
    %12 = vector.extract_strided_slice %9 {offsets = [0, 32], sizes = [16, 32], strides = [1, 1]} : vector<16x64xf32> to vector<16x32xf32>
    %13 = arith.truncf %12 : vector<16x32xf32> to vector<16x32xbf16>
    %c0_8 = arith.constant 0 : index
    %c0_9 = arith.constant 0 : index
    %14 = vector.load %arg5[%c0_8, %c0_9] : memref<32x32xbf16, #tpu.memory_space<vmem>>, vector<32x32xbf16>
    %cst_10 = arith.constant dense<0.000000e+00> : vector<16x32xf32>
    %15 = tpu.matmul %11, %14, %cst_10 {dimension_numbers = #tpu.dot_dimension_numbers<[1], [0], [0], [1], [0, 0, 1, 1], [], []>} : vector<16x32xbf16>, vector<32x32xbf16>, vector<16x32xf32> -> vector<16x32xf32>
    %c0_11 = arith.constant 0 : index
    %c0_12 = arith.constant 0 : index
    %16 = vector.load %arg7[%c0_11, %c0_12] : memref<1x32xf32, #tpu.memory_space<vmem>>, vector<1x32xf32>
    %17 = vector.broadcast %16 : vector<1x32xf32> to vector<16x32xf32>
    %18 = arith.addf %15, %17 : vector<16x32xf32>
    %c0_13 = arith.constant 0 : index
    %c0_14 = arith.constant 0 : index
    %19 = vector.load %arg6[%c0_13, %c0_14] : memref<32x32xbf16, #tpu.memory_space<vmem>>, vector<32x32xbf16>
    %cst_15 = arith.constant dense<0.000000e+00> : vector<16x32xf32>
    %20 = tpu.matmul %13, %19, %cst_15 {dimension_numbers = #tpu.dot_dimension_numbers<[1], [0], [0], [1], [0, 0, 1, 1], [], []>} : vector<16x32xbf16>, vector<32x32xbf16>, vector<16x32xf32> -> vector<16x32xf32>
    %c0_16 = arith.constant 0 : index
    %c0_17 = arith.constant 0 : index
    %21 = vector.load %arg8[%c0_16, %c0_17] : memref<1x32xf32, #tpu.memory_space<vmem>>, vector<1x32xf32>
    %22 = vector.broadcast %21 : vector<1x32xf32> to vector<16x32xf32>
    %23 = arith.addf %20, %22 : vector<16x32xf32>
    %cst_18 = arith.constant dense<0.000000e+00> : vector<16xf32>
    %24 = vector.multi_reduction <add>, %0, %cst_18 [1] : vector<16x32xf32> to vector<16xf32>
    %25 = vector.shape_cast %24 : vector<16xf32> to vector<16x1xf32>
    %cst_19 = arith.constant 3.200000e+01 : f32
    %26 = vector.broadcast %cst_19 : f32 to vector<16x1xf32>
    %27 = arith.divf %25, %26 : vector<16x1xf32>
    %28 = vector.broadcast %27 : vector<16x1xf32> to vector<16x32xf32>
    %29 = arith.subf %0, %28 : vector<16x32xf32>
    %30 = arith.mulf %29, %29 : vector<16x32xf32>
    %cst_20 = arith.constant dense<0.000000e+00> : vector<16xf32>
    %31 = vector.multi_reduction <add>, %30, %cst_20 [1] : vector<16x32xf32> to vector<16xf32>
    %32 = vector.shape_cast %31 : vector<16xf32> to vector<16x1xf32>
    %cst_21 = arith.constant 3.100000e+01 : f32
    %33 = vector.broadcast %cst_21 : f32 to vector<16x1xf32>
    %34 = arith.divf %32, %33 : vector<16x1xf32>
    %35 = math.sqrt %34 : vector<16x1xf32>
    %cst_22 = arith.constant 9.99999997E-7 : f32
    %36 = vector.broadcast %cst_22 : f32 to vector<16x1xf32>
    %37 = arith.addf %35, %36 : vector<16x1xf32>
    %38 = tpu.reciprocal %37 {approx = true} : vector<16x1xf32> -> vector<16x1xf32>
    %39 = vector.broadcast %38 : vector<16x1xf32> to vector<16x32xf32>
    %40 = arith.mulf %29, %39 : vector<16x32xf32>
    %41 = arith.mulf %18, %40 : vector<16x32xf32>
    %42 = arith.addf %41, %23 : vector<16x32xf32>
    %c0_23 = arith.constant 0 : index
    %c0_24 = arith.constant 0 : index
    %43 = vector.load %arg9[%c0_23, %c0_24] : memref<16x32xf32, #tpu.memory_space<vmem>>, vector<16x32xf32>
    tpu.vector_store %arg9[%c0_23, %c0_24], %42 {strides = array<i32>} : memref<16x32xf32, #tpu.memory_space<vmem>>, vector<16x32xf32>,
    return
  }
  func.func @transform_0(%arg0: i32) -> (i32, i32) {
    %c0_i32 = arith.constant 0 : i32
    %c0_i32_0 = arith.constant 0 : i32
    return %arg0, %c0_i32 : i32, i32
  }
  func.func @transform_1(%arg0: i32) -> (i32, i32) {
    %c0_i32 = arith.constant 0 : i32
    %c0_i32_0 = arith.constant 0 : i32
    return %arg0, %c0_i32 : i32, i32
  }
  func.func @transform_2(%arg0: i32) -> (i32, i32) {
    %c0_i32 = arith.constant 0 : i32
    %c0_i32_0 = arith.constant 0 : i32
    %c0_i32_1 = arith.constant 0 : i32
    return %c0_i32, %c0_i32_0 : i32, i32
  }
  func.func @transform_3(%arg0: i32) -> (i32, i32) {
    %c0_i32 = arith.constant 0 : i32
    %c0_i32_0 = arith.constant 0 : i32
    %c0_i32_1 = arith.constant 0 : i32
    return %c0_i32, %c0_i32_0 : i32, i32
  }
  func.func @transform_4(%arg0: i32) -> (i32, i32) {
    %c0_i32 = arith.constant 0 : i32
    %c0_i32_0 = arith.constant 0 : i32
    %c0_i32_1 = arith.constant 0 : i32
    return %c0_i32, %c0_i32_0 : i32, i32
  }
  func.func @transform_5(%arg0: i32) -> (i32, i32) {
    %c0_i32 = arith.constant 0 : i32
    %c0_i32_0 = arith.constant 0 : i32
    %c0_i32_1 = arith.constant 0 : i32
    return %c0_i32, %c0_i32_0 : i32, i32
  }
  func.func @transform_6(%arg0: i32) -> (i32, i32) {
    %c0_i32 = arith.constant 0 : i32
    %c0_i32_0 = arith.constant 0 : i32
    %c0_i32_1 = arith.constant 0 : i32
    return %c0_i32, %c0_i32_0 : i32, i32
  }
  func.func @transform_7(%arg0: i32) -> (i32, i32) {
    %c0_i32 = arith.constant 0 : i32
    %c0_i32_0 = arith.constant 0 : i32
    %c0_i32_1 = arith.constant 0 : i32
    return %c0_i32, %c0_i32_0 : i32, i32
  }
  func.func @transform_8(%arg0: i32) -> (i32, i32) {
    %c0_i32 = arith.constant 0 : i32
    %c0_i32_0 = arith.constant 0 : i32
    return %arg0, %c0_i32 : i32, i32
  }
}

</mosaic_0001>

<bundles_post_ra>
// kernel: tpu_custom_call.1
= control target key start
LH: loop header
LB: loop body
LE: loop exit
PB: predicated region body
PF: predicated region fallthrough
CT: control target
= control target key end

     0   :  { %v469_v1 = vmov 0.0   ;;  %vm470_vm0 = vmmov 0   ;;  %s591_s0 = inlined_call_operand.vmem [shape: f32[16,32], index: 0, kind: input, shape index: {}]   ;;  %s592_s1 = inlined_call_operand.vmem [shape: f32[16,128], index: 1, kind: input, shape index: {}]   ;;  %s593_s2 = inlined_call_operand.vmem [shape: bf16[128,64], index: 2, kind: input, shape index: {}]   ;;  %s594_s3 = inlined_call_operand.vmem [shape: f32[1,64], index: 3, kind: input, shape index: {}]   ;;  %s595_s4 = inlined_call_operand.vmem [shape: bf16[32,32], index: 4, kind: input, shape index: {}]   ;;  %s596_s5 = inlined_call_operand.vmem [shape: bf16[32,32], index: 5, kind: input, shape index: {}]   ;;  %s597_s6 = inlined_call_operand.vmem [shape: f32[1,32], index: 6, kind: input, shape index: {}]   ;;  %s598_s7 = inlined_call_operand.vmem [shape: f32[1,32], index: 7, kind: input, shape index: {}]   ;;  %s599_s8 = inlined_call_operand.hbm [shape: f32[16,32], index: 8, kind: output, shape index: {}]  }
   0x1   :  { %v427_v0 = vld [vmem:[%s593_s2 + $0x38] sm:$0xff]   ;;  %385 = vmatprep.subr.bf16.mxu0 %v469_v1  ;;  %405 = vmatprep.subr.bf16.mxu1 %v469_v1  ;;  %v428_v2 = vld [vmem:[%s593_s2 + $0x30] sm:$0xff]   ;;  %v429_v3 = vld [vmem:[%s593_s2 + $0x28] sm:$0xff]  }
   0x2   :  { %386 = vmatpush3.bf16.msra.mxu0 %v427_v0  ;;  %401 = vmatprep.mubr.msk.bf16.mxu0 %vm470_vm0, %v469_v1  ;;  %v430_v4 = vld [vmem:[%s593_s2 + $0x20] sm:$0xff]  }
   0x3   :  { %387 = vmatprep.subr.bf16.mxu0 %v469_v1  ;;  %409 = vmatprep.mubr.msk.bf16.mxu1 %vm470_vm0, %v469_v1 }
   0x6   :  { %388 = vmatpush3.bf16.msra.mxu0 %v428_v2 }
   0x7   :  { %389 = vmatprep.subr.bf16.mxu0 %v469_v1 }
   0xa   :  { %390 = vmatpush3.bf16.msra.mxu0 %v429_v3 }
   0xb   :  { %391 = vmatprep.subr.bf16.mxu0 %v469_v1 }
   0xc   :  { %13 = vsyncpa [#allocation3], 0  ;;  %v431_v5 = vld [vmem:[%s593_s2 + $0x18] sm:$0xff]   ;;  %v432_v6 = vld [vmem:[%s593_s2 + $0x10] sm:$0xff]   ;;  %vm174_vm1 = vcmask 261120   ;;  %s471_s10 = smov 96  }
   0xd   :  { %v433_v7 = vld [vmem:[%s593_s2 + $0x8] sm:$0xff]   ;;  %v434_v8 = vld [vmem:[%s593_s2] sm:$0xff]   ;;  %s472_s16 = smov [#allocation2]  }
   0xe   :  { %392 = vmatpush3.bf16.msra.mxu0 %v430_v4  ;;  %v33_v9 = vld [vmem:[%s592_s1] sm:$0xff]  ;;  %v34_v10 = vld [vmem:[%s592_s1 + $0x8] sm:$0xff]  ;;  %s342_s17 = sshll.u32 %s472_s16, 4  ;;  %s343_s17 = int_to_ptr.vmem [resolvable:$true] %s342_s17 }
   0xf   :  { %393 = vmatprep.subr.bf16.mxu0 %v469_v1  ;;  %v35_v11 = vpack.c.bf16 %v34_v10, %v33_v9  ;;  %v435_v12 = vld [vmem:[%s595_s4 + $0x8] sm:$0xff]   ;;  %v436_v13 = vld [vmem:[%s595_s4] sm:$0xff]   ;;  %p452_p1 = scmp.lt.s32.totalorder %s343_s17, %s343_s17 }
  0x10   :  { %406 = vmatpush3.bf16.msra.mxu1 %v435_v12  ;;  %v32_v14 = vld [vmem:[%s591_s0 + $0x8] sm:$0xff]  ;;  %v353_v16 = vld [vmem:[%s594_s3] ss:$0 sm:$0xff] }
  0x11   :  { %407 = vmatprep.subr.bf16.mxu1 %v469_v1  ;;  %v292_v15 = vsel %vm174_vm1, %v32_v14, 0.0  ;;  %v437_v25 = vld [vmem:[%s596_s5 + $0x8] sm:$0xff]   ;;  %v438_v27 = vld [vmem:[%s596_s5] sm:$0xff]  }
  0x12   :  { %394 = vmatpush3.bf16.msra.mxu0 %v431_v5  ;;  %293 = vadd.xlane.f32.xlu1 %v292_v15  ;;  %v31_v28 = vld [vmem:[%s591_s0] sm:$0xff] }
  0x13   :  { %395 = vmatprep.subr.bf16.mxu0 %v469_v1  ;;  %v289_v29 = vsel %vm174_vm1, %v31_v28, 0.0  ;;  %v366_v3 = vld [vmem:[%s598_s7] ss:$0 sm:$0xff] }
  0x14   :  { %408 = vmatpush3.bf16.msra.mxu1 %v436_v13 }
  0x15   :  { %413 = vmatprep.subr.bf16.mxu1 %v469_v1 }
  0x16   :  { %396 = vmatpush3.bf16.msra.mxu0 %v432_v6 }
  0x17   :  { %397 = vmatprep.subr.bf16.mxu0 %v469_v1 }
  0x1a   :  { %398 = vmatpush3.bf16.msra.mxu0 %v433_v7 }
  0x1b   :  { %399 = vmatprep.subr.bf16.mxu0 %v469_v1 }
  0x1e   :  { %400 = vmatpush3.bf16.msra.mxu0 %v434_v8 }
  0x21   :  { %402 = vmatmul.mubr.bf16.vlgmr.msra.gmra.mxu0 %v35_v11 }
  0x9b   :  { %v294_v31 = vpop.xlane.xlu1 %293 }
  0x9c   :  { %v297_v32 = vmul.f32 0.03125, %v294_v31 }
  0x9e   :  { %v299_v35 = vsub.f32 %v32_v14, %v297_v32 }
  0xa0   :  { %v301_v38 = vmul.f32 %v299_v35, %v299_v35 }
  0xa2   :  { %v305_v40 = vsel %vm174_vm1, %v301_v38, 0.0 }
  0xe1   :  { %v141_v17 = vpop.f32.mrf.mxu0 }
  0xe2   :  { %v142_v19 = vadd.f32 %v353_v16, %v141_v17 }
  0xe3   :  { %v403_v18 = vpop.f32.mrf.mxu0 }
  0xe4   :  { %v148_v23 = vmax.f32 %v142_v19, 0.0 }
  0xe5   :  { %v144_v20 = vpop.f32.mrf.mxu0 }
  0xe6   :  { %v145_v21 = vadd.f32 %v353_v16, %v144_v20 }
  0xe7   :  { %v404_v22 = vpop.f32.mrf.mxu0 }
  0xe8   :  { %v149_v24 = vmax.f32 %v145_v21, 0.0 }
  0xea   :  { %v150_v26 = vpack.c.bf16 %v149_v24, %v148_v23 }
  0xec   :  { %231 = vrot.lane.b32.xlu0 %v150_v26, %s471_s10  ;;  %410 = vmatmul.mubr.msk.bf16.vlgmr.msra.gmra.mxu1 %vm174_vm1, %v150_v26 }
  0xed   :  { %414 = vmatpush3.bf16.msra.mxu1 %v437_v25  ;;  %417 = vmatprep.mubr.msk.bf16.mxu1 %vm470_vm0, %v469_v1 }
  0xee   :  { %415 = vmatprep.subr.bf16.mxu1 %v469_v1  ;;  %v362_v1 = vld [vmem:[%s597_s6] ss:$0 sm:$0xff]  ;;  %s447_s6 = scalar_lea.vmem %s343_s17, 256 }
  0xef   :  { %p448_p0 = scmp.ne.s32.totalorder %s343_s17, %s447_s6  ;;  %p453_p2 = scmp.lt.s32.totalorder %s447_s6, %s447_s6 }
  0xf1   :  { %416 = vmatpush3.bf16.msra.mxu1 %v438_v27  ;;  %p454_p3 = por %p453_p2, %p452_p1 }
  0xf3   :  { %p455_p4 = pnand %p454_p3, %p448_p0 }
 0x10b   :  { %290 = vadd.xlane.f32.xlu0 %v289_v29 }
 0x15e   :  { %v232_v30 = vpop.permute.xlu0 %231 }
 0x15f   :  { %418 = vmatmul.mubr.msk.bf16.vlgmr.msra.gmra.mxu1 %vm174_vm1, %v232_v30 }
 0x194   :  { %v291_v33 = vpop.xlane.xlu0 %290 }
 0x195   :  { %v296_v34 = vmul.f32 0.03125, %v291_v33 }
 0x197   :  { %v298_v36 = vsub.f32 %v31_v28, %v296_v34 }
 0x199   :  { %v300_v37 = vmul.f32 %v298_v36, %v298_v36 }
 0x19b   :  { %v302_v39 = vsel %vm174_vm1, %v300_v37, 0.0 }
 0x19c   :  { %303 = vadd.xlane.f32.xlu1 %v302_v39 }
 0x1a0   :  { %306 = vadd.xlane.f32.xlu1 %v305_v40 }
 0x1ac   :  { %v212_v41 = vpop.f32.mrf.mxu1 }
 0x1ad   :  { %v213_v4 = vadd.f32 %v362_v1, %v212_v41 }
 0x1ae   :  { %v411_v42 = vpop.f32.mrf.mxu1 }
 0x1b0   :  { %v215_v43 = vpop.f32.mrf.mxu1 }
 0x1b1   :  { %v216_v9 = vadd.f32 %v362_v1, %v215_v43 }
 0x1b2   :  { %v412_v44 = vpop.f32.mrf.mxu1 }
 0x21f   :  { %v282_v45 = vpop.f32.mrf.mxu1 }
 0x220   :  { %v283_v6 = vadd.f32 %v366_v3, %v282_v45 }
 0x221   :  { %v419_v46 = vpop.f32.mrf.mxu1 }
 0x223   :  { %v285_v47 = vpop.f32.mrf.mxu1 }
 0x224   :  { %v286_v12 = vadd.f32 %v366_v3, %v285_v47 }
 0x225   :  { %v420_v48 = vpop.f32.mrf.mxu1  ;;  %v304_v49 = vpop.xlane.xlu1 %303 }
 0x226   :  { %v309_v50 = vmul.f32 0.032258064, %v304_v49 }
 0x228   :  { %439 = vrsqrt.f32 %v309_v50  ;;  %vm313_vm2 = vcmp.eq.f32.partialorder %v309_v50, inf  ;;  %v316_v55 = vand.u32 2147483648, %v309_v50  ;;  %vm315_vm3 = vcmp.eq.f32.partialorder %v309_v50, 0.0 }
 0x229   :  { %v307_v51 = vpop.xlane.xlu1 %306 }
 0x22a   :  { %v310_v52 = vmul.f32 0.032258064, %v307_v51 }
 0x22c   :  { %441 = vrsqrt.f32 %v310_v52  ;;  %vm320_vm4 = vcmp.eq.f32.partialorder %v310_v52, inf  ;;  %v323_v61 = vand.u32 2147483648, %v310_v52  ;;  %vm322_vm5 = vcmp.eq.f32.partialorder %v310_v52, 0.0 }
 0x235   :  { %v440_v53 = vpop.eup %439 }
 0x236   :  { %v312_v54 = vmul.f32 %v440_v53, %v309_v50 }
 0x238   :  { %v314_v56 = vsel %vm313_vm2, %v309_v50, %v312_v54 }
 0x239   :  { %v442_v57 = vpop.eup %441  ;;  %v317_v58 = vsel %vm315_vm3, %v316_v55, %v314_v56 }
 0x23a   :  { %v325_v59 = vadd.f32 1e-06, %v317_v58  ;;  %v319_v60 = vmul.f32 %v442_v57, %v310_v52 }
 0x23c   :  { %443 = vrcp.f32 %v325_v59  ;;  %v321_v62 = vsel %vm320_vm4, %v310_v52, %v319_v60 }
 0x23d   :  { %v324_v63 = vsel %vm322_vm5, %v323_v61, %v321_v62 }
 0x23e   :  { %v326_v0 = vadd.f32 1e-06, %v324_v63 }
 0x240   :  { %445 = vrcp.f32 %v326_v0 }
 0x249   :  { %v444_v2 = vpop.eup %443 }
 0x24a   :  { %v329_v5 = vmul.f32 %v444_v2, %v298_v36 }
 0x24c   :  { %v331_v7 = vmul.f32 %v329_v5, %v213_v4 }
 0x24d   :  { %v446_v8 = vpop.eup %445 }
 0x24e   :  { %v330_v10 = vmul.f32 %v446_v8, %v299_v35  ;;  %v333_v11 = vadd.f32 %v331_v7, %v283_v6 }
 0x250   :  { %v332_v13 = vmul.f32 %v330_v10, %v216_v9  ;;  %335 = vst.msk [vmem:[#allocation2] sm:$0xff] %vm174_vm1, %v333_v11 }
 0x252   :  { %v334_v14 = vadd.f32 %v332_v13, %v286_v12 }
 0x254   :  { %336 = vst.msk [vmem:[#allocation2 + $0x8] sm:$0xff] %vm174_vm1, %v334_v14 }
 0x255   :  { %458 = shalt.err (!%p455_p4)
}
 0x256   :  { %s473_s7 = smov 128   ;;  %s474_s18 = smov 8  }
 0x257   :  { %348 = dma.vmem_to_hbm [thread:$0]  %s343_s17, 256, %s599_s8, [#allocation3], %s473_s7, %s473_s7, %s474_s18  }
 0x258   :  { %467 = dma.done.wait [#allocation3], 256  }
 0x259   :  { %468 = vsyncadd [#allocation3], 4294967040 }
 0x25a   :  { %352 = vsyncpa [#allocation3], 1 }

</bundles_post_ra>
